<compile_context>
chip_gen: v5e
topology: v5e:2x2
jax: 0.10.0
libtpu: 0.0.40
codegen_flags: <defaults>
</compile_context>

<pallas_src>
import functools

import jax
import jax.numpy as jnp
from jax.experimental import pallas as pl
from jax.experimental.pallas import tpu as pltpu


def _distill_kl_kernel(ys_ref, yt_ref, out_ref, *, inv_T: float, scale: float):
    """One (TB, C) tile: accumulate its KL contribution into out_ref[0, 0]."""
    i = pl.program_id(1)  # reduction (batch-tile) axis

    @pl.when(i == 0)
    def _():
        out_ref[0, 0] = jnp.float32(0.0)

    # Stream in native dtype, upcast in-register; multiply by 1/T (no divide).
    ys = ys_ref[...].astype(jnp.float32) * inv_T
    yt = yt_ref[...].astype(jnp.float32) * inv_T

    # Student log_softmax along the class (lane) axis.
    ys_max = jnp.max(ys, axis=1, keepdims=True)
    ys_sh = ys - ys_max
    log_z_s = jnp.log(jnp.sum(jnp.exp(ys_sh), axis=1, keepdims=True))
    log_p_s = ys_sh - log_z_s

    # Teacher softmax along the class axis (kept in un-normalized exp form so
    # the only divide is per-row, after the class reduction).
    yt_max = jnp.max(yt, axis=1, keepdims=True)
    yt_sh = yt - yt_max
    exp_t = jnp.exp(yt_sh)
    z_t = jnp.sum(exp_t, axis=1, keepdims=True)
    log_p_t = yt_sh - jnp.log(z_t)

    # sum_c p_t * (log p_t - log p_s)  ==  (sum_c exp_t * (log p_t - log p_s)) / z_t
    per_row = jnp.sum(exp_t * (log_p_t - log_p_s), axis=1, keepdims=True)
    kl_tile = jnp.sum(per_row * (1.0 / z_t))

    out_ref[0, 0] += kl_tile

    @pl.when(i == pl.num_programs(1) - 1)
    def _():
        out_ref[0, 0] = out_ref[0, 0] * scale


def _sublane(dtype) -> int:
    return {4: 8, 2: 16, 1: 32}.get(jnp.dtype(dtype).itemsize, 8)


def distill_kl(y_s: jax.Array, y_t: jax.Array, T: float, *, tb: int | None = None) -> jax.Array:
    """Pallas implementation of DistillKL.forward. Returns a scalar loss."""
    assert y_s.shape == y_t.shape and y_s.ndim == 2
    B, C = y_s.shape
    sub = max(_sublane(y_s.dtype), _sublane(y_t.dtype))

    # Pick a batch tile so one f32 working tile is ~4 MiB (double-buffered bf16/
    # f32 inputs + f32 intermediates stay well under v7x's 64 MiB VMEM).
    if tb is None:
        target_f32_tile_bytes = 4 * 1024 * 1024
        tb = max(sub, (target_f32_tile_bytes // (C * 4)) // sub * sub)
        tb = min(tb, 1024)

    if B <= tb:
        # Single tile: full-extent block satisfies the (8,128) rule by equality.
        TB, nsplit, n_inner, B_pad = B, 1, 1, B
    else:
        TB = max(sub, (tb // sub) * sub)
        # Split the batch across the two v7x TensorCores when there is enough work.
        nsplit = 2 if B >= 4 * TB else 1
        chunk = nsplit * TB
        B_pad = ((B + chunk - 1) // chunk) * chunk
        n_inner = B_pad // chunk

    if B_pad != B:
        # Zero logit rows -> identical uniform p_s / p_t -> 0 KL contribution.
        pad = ((0, B_pad - B), (0, 0))
        y_s = jnp.pad(y_s, pad)
        y_t = jnp.pad(y_t, pad)

    kernel = functools.partial(
        _distill_kl_kernel,
        inv_T=float(1.0 / T),
        scale=float(T) * float(T) / float(B),
    )

    in_map = lambda s, i: (s * n_inner + i, 0)

    out = pl.pallas_call(
        kernel,
        out_shape=jax.ShapeDtypeStruct((nsplit, 1), jnp.float32),
        grid_spec=pl.GridSpec(
            grid=(nsplit, n_inner),
            in_specs=[
                pl.BlockSpec((TB, C), in_map),
                pl.BlockSpec((TB, C), in_map),
            ],
            # Per-split scalar accumulator, resident in SMEM across the
            # reduction axis (block index constant in i).
            out_specs=pl.BlockSpec((1, 1), lambda s, i: (s, 0),
                                   memory_space=pltpu.SMEM),
        ),
        compiler_params=pltpu.CompilerParams(
            dimension_semantics=("parallel", "arbitrary"),
            vmem_limit_bytes=48 * 1024 * 1024,
        ),
    )(y_s, y_t)

    # Sum per-core partials (each already scaled by T^2 / B).
    return jnp.sum(out)


def distill_kl_ref(y_s, y_t, T):
    """Pure-JAX reference for correctness checking."""
    y_s = y_s.astype(jnp.float32)
    y_t = y_t.astype(jnp.float32)
    p_s = jax.nn.log_softmax(y_s / T, axis=1)
    log_p_t = jax.nn.log_softmax(y_t / T, axis=1)
    p_t = jnp.exp(log_p_t)
    kl = jnp.sum(p_t * (log_p_t - p_s))
    return kl * T ** 2 / y_s.shape[0]


if __name__ == "__main__":
    key = jax.random.PRNGKey(0)
    k1, k2, k3, k4 = jax.random.split(key, 4)
    T = 4.0

    # 1) Small shape consistent with the module (single full-extent tile).
    B, C = 2, 16
    y_s = jax.random.normal(k1, (B, C), dtype=jnp.float32)
    y_t = jax.random.normal(k2, (B, C), dtype=jnp.float32)
    loss = distill_kl(y_s, y_t, T)
    jax.block_until_ready(loss)
    ref = distill_kl_ref(y_s, y_t, T)
    assert jnp.allclose(loss, ref, atol=1e-5, rtol=1e-5), (loss, ref)

    # 2) Exercise the tiled / padded / core-split accumulator path
    #    (B=70 rows, forced 8-row tiles -> grid (2, 5) with 10 zero-pad rows).
    B2, C2 = 70, 256
    ys2 = jax.random.normal(k3, (B2, C2), dtype=jnp.float32)
    yt2 = jax.random.normal(k4, (B2, C2), dtype=jnp.float32)
    loss2 = distill_kl(ys2, yt2, T, tb=8)
    jax.block_until_ready(loss2)
    ref2 = distill_kl_ref(ys2, yt2, T)
    assert jnp.allclose(loss2, ref2, atol=1e-5, rtol=1e-4), (loss2, ref2)

    # 3) bf16 streaming path (upcast to f32 inside the kernel only).
    ys3 = ys2.astype(jnp.bfloat16)
    yt3 = yt2.astype(jnp.bfloat16)
    loss3 = distill_kl(ys3, yt3, T, tb=16)
    jax.block_until_ready(loss3)
    ref3 = distill_kl_ref(ys3, yt3, T)
    assert jnp.allclose(loss3, ref3, atol=1e-4, rtol=1e-4), (loss3, ref3)

    print("KERNEL_OK")
</pallas_src>

<mosaic_0001>
module attributes {stable_mosaic.version = 11 : i64} {
  func.func @_distill_kl_kernel(%arg0: i32, %arg1: i32, %arg2: memref<2x16xf32, #tpu.memory_space<vmem>>, %arg3: memref<2x16xf32, #tpu.memory_space<vmem>>, %arg4: memref<1x1xf32, #tpu.memory_space<smem>>) attributes {dimension_semantics = [#tpu.dimension_semantics<parallel>, #tpu.dimension_semantics<arbitrary>], iteration_bounds = array<i64: 1, 1>, scalar_prefetch = 0 : i64, scratch_operands = 0 : i64, tpu.core_type = #tpu.core_type<tc>, window_params = [{transform_indices = @transform_0, window_bounds = array<i64: 2, 16>}, {transform_indices = @transform_1, window_bounds = array<i64: 2, 16>}, {transform_indices = @transform_2, window_bounds = array<i64: 1, 1>}]} {
    %c0_i32 = arith.constant 0 : i32
    %0 = arith.cmpi eq, %arg1, %c0_i32 : i32
    %1 = arith.extui %0 : i1 to i32
    %c0_i32_0 = arith.constant 0 : i32
    %2 = arith.cmpi ne, %1, %c0_i32_0 : i32
    scf.if %2 {
      %cst_18 = arith.constant 0.000000e+00 : f32
      %c0_19 = arith.constant 0 : index
      %c0_20 = arith.constant 0 : index
      %46 = memref.load %arg4[%c0_19, %c0_20] : memref<1x1xf32, #tpu.memory_space<smem>>
      memref.store %cst_18, %arg4[%c0_19, %c0_20] : memref<1x1xf32, #tpu.memory_space<smem>>
    } else {
    }
    %c0 = arith.constant 0 : index
    %c0_1 = arith.constant 0 : index
    %3 = vector.load %arg2[%c0, %c0_1] : memref<2x16xf32, #tpu.memory_space<vmem>>, vector<2x16xf32>
    %cst = arith.constant 2.500000e-01 : f32
    %4 = vector.broadcast %cst : f32 to vector<2x16xf32>
    %5 = arith.mulf %3, %4 : vector<2x16xf32>
    %c0_2 = arith.constant 0 : index
    %c0_3 = arith.constant 0 : index
    %6 = vector.load %arg3[%c0_2, %c0_3] : memref<2x16xf32, #tpu.memory_space<vmem>>, vector<2x16xf32>
    %cst_4 = arith.constant 2.500000e-01 : f32
    %7 = vector.broadcast %cst_4 : f32 to vector<2x16xf32>
    %8 = arith.mulf %6, %7 : vector<2x16xf32>
    %cst_5 = arith.constant dense<0xFF800000> : vector<2xf32>
    %9 = vector.multi_reduction <maximumf>, %5, %cst_5 [1] : vector<2x16xf32> to vector<2xf32>
    %10 = vector.shape_cast %9 : vector<2xf32> to vector<2x1xf32>
    %11 = vector.broadcast %10 : vector<2x1xf32> to vector<2x16xf32>
    %12 = arith.subf %5, %11 : vector<2x16xf32>
    %13 = math.exp %12 : vector<2x16xf32>
    %cst_6 = arith.constant dense<0.000000e+00> : vector<2xf32>
    %14 = vector.multi_reduction <add>, %13, %cst_6 [1] : vector<2x16xf32> to vector<2xf32>
    %15 = vector.shape_cast %14 : vector<2xf32> to vector<2x1xf32>
    %16 = math.log %15 : vector<2x1xf32>
    %17 = vector.broadcast %16 : vector<2x1xf32> to vector<2x16xf32>
    %18 = arith.subf %12, %17 : vector<2x16xf32>
    %cst_7 = arith.constant dense<0xFF800000> : vector<2xf32>
    %19 = vector.multi_reduction <maximumf>, %8, %cst_7 [1] : vector<2x16xf32> to vector<2xf32>
    %20 = vector.shape_cast %19 : vector<2xf32> to vector<2x1xf32>
    %21 = vector.broadcast %20 : vector<2x1xf32> to vector<2x16xf32>
    %22 = arith.subf %8, %21 : vector<2x16xf32>
    %23 = math.exp %22 : vector<2x16xf32>
    %cst_8 = arith.constant dense<0.000000e+00> : vector<2xf32>
    %24 = vector.multi_reduction <add>, %23, %cst_8 [1] : vector<2x16xf32> to vector<2xf32>
    %25 = vector.shape_cast %24 : vector<2xf32> to vector<2x1xf32>
    %26 = math.log %25 : vector<2x1xf32>
    %27 = vector.broadcast %26 : vector<2x1xf32> to vector<2x16xf32>
    %28 = arith.subf %22, %27 : vector<2x16xf32>
    %29 = arith.subf %28, %18 : vector<2x16xf32>
    %30 = arith.mulf %23, %29 : vector<2x16xf32>
    %cst_9 = arith.constant dense<0.000000e+00> : vector<2xf32>
    %31 = vector.multi_reduction <add>, %30, %cst_9 [1] : vector<2x16xf32> to vector<2xf32>
    %32 = vector.shape_cast %31 : vector<2xf32> to vector<2x1xf32>
    %cst_10 = arith.constant 1.000000e+00 : f32
    %33 = vector.broadcast %cst_10 : f32 to vector<2x1xf32>
    %34 = arith.divf %33, %25 : vector<2x1xf32>
    %35 = arith.mulf %32, %34 : vector<2x1xf32>
    %36 = vector.shape_cast %35 : vector<2x1xf32> to vector<1x2x1xf32>
    %cst_11 = arith.constant dense<0.000000e+00> : vector<1xf32>
    %37 = vector.multi_reduction <add>, %36, %cst_11 [1, 2] : vector<1x2x1xf32> to vector<1xf32>
    %38 = vector.shape_cast %37 : vector<1xf32> to vector<1x1x1xf32>
    %39 = vector.extract %38[0, 0, 0] : f32 from vector<1x1x1xf32>
    %c0_12 = arith.constant 0 : index
    %c0_13 = arith.constant 0 : index
    %40 = memref.load %arg4[%c0_12, %c0_13] : memref<1x1xf32, #tpu.memory_space<smem>>
    %41 = arith.addf %40, %39 : f32
    %c0_14 = arith.constant 0 : index
    %c0_15 = arith.constant 0 : index
    %42 = memref.load %arg4[%c0_14, %c0_15] : memref<1x1xf32, #tpu.memory_space<smem>>
    memref.store %41, %arg4[%c0_14, %c0_15] : memref<1x1xf32, #tpu.memory_space<smem>>
    %c0_i32_16 = arith.constant 0 : i32
    %43 = arith.cmpi eq, %arg1, %c0_i32_16 : i32
    %44 = arith.extui %43 : i1 to i32
    %c0_i32_17 = arith.constant 0 : i32
    %45 = arith.cmpi ne, %44, %c0_i32_17 : i32
    scf.if %45 {
      %c0_18 = arith.constant 0 : index
      %c0_19 = arith.constant 0 : index
      %46 = memref.load %arg4[%c0_18, %c0_19] : memref<1x1xf32, #tpu.memory_space<smem>>
      %cst_20 = arith.constant 8.000000e+00 : f32
      %47 = arith.mulf %46, %cst_20 : f32
      %c0_21 = arith.constant 0 : index
      %c0_22 = arith.constant 0 : index
      %48 = memref.load %arg4[%c0_21, %c0_22] : memref<1x1xf32, #tpu.memory_space<smem>>
      memref.store %47, %arg4[%c0_21, %c0_22] : memref<1x1xf32, #tpu.memory_space<smem>>
    } else {
    }
    return
  }
  func.func @transform_0(%arg0: i32, %arg1: i32) -> (i32, i32) {
    %c1_i32 = arith.constant 1 : i32
    %0 = arith.muli %arg0, %c1_i32 : i32
    %1 = arith.addi %0, %arg1 : i32
    %c0_i32 = arith.constant 0 : i32
    %c0_i32_0 = arith.constant 0 : i32
    return %1, %c0_i32 : i32, i32
  }
  func.func @transform_1(%arg0: i32, %arg1: i32) -> (i32, i32) {
    %c1_i32 = arith.constant 1 : i32
    %0 = arith.muli %arg0, %c1_i32 : i32
    %1 = arith.addi %0, %arg1 : i32
    %c0_i32 = arith.constant 0 : i32
    %c0_i32_0 = arith.constant 0 : i32
    return %1, %c0_i32 : i32, i32
  }
  func.func @transform_2(%arg0: i32, %arg1: i32) -> (i32, i32) {
    %c0_i32 = arith.constant 0 : i32
    %c0_i32_0 = arith.constant 0 : i32
    return %arg0, %c0_i32 : i32, i32
  }
}

</mosaic_0001>

<bundles_post_ra>
// kernel: tpu_custom_call.1
= control target key start
LH: loop header
LB: loop body
LE: loop exit
PB: predicated region body
PF: predicated region fallthrough
CT: control target
= control target key end

     0   :  { %7 = vsyncpa [#allocation3], 0  ;;  %s256_s0 = inlined_call_operand.hbm [shape: f32[2,16], index: 0, kind: input, shape index: {}]   ;;  %s257_s1 = inlined_call_operand.hbm [shape: f32[2,16], index: 1, kind: input, shape index: {}]   ;;  %s258_s2 = inlined_call_operand.hbm [shape: f32[1,1], index: 2, kind: output, shape index: {}]  }
   0x1   :  { %8 = vsyncpa [#allocation6], 0 }
   0x2   :  { %9 = vsyncpa [#allocation4], 0  ;;  %s18_s11 = sshll.u32 %s256_s0, 4  ;;  %s224_s12 = smov [#allocation2]   ;;  %s19_s11 = int_to_ptr.hbm [resolvable:$true] %s18_s11 }
   0x3   :  { %s20_s13 = sshll.u32 %s224_s12, 4  ;;  %s32_s16 = sshll.u32 %s257_s1, 4  ;;  %s21_s13 = int_to_ptr.vmem [resolvable:$true] %s20_s13  ;;  %s33_s16 = int_to_ptr.hbm [resolvable:$true] %s32_s16 }
   0x4   :  { %23 = dma.hbm_to_vmem [thread:$0]  %s19_s11, 32, %s21_s13, [#allocation3]  }
   0x5   :  { %s225_s17 = smov [#allocation5]  }
   0x6   :  { %s34_s18 = sshll.u32 %s225_s17, 4  ;;  %s35_s18 = int_to_ptr.vmem [resolvable:$true] %s34_s18 }
   0x7   :  { %37 = dma.hbm_to_vmem [thread:$0]  %s33_s16, 32, %s35_s18, [#allocation6]  }
   0x8   :  { %218 = dma.done.wait [#allocation3], 32  }
   0x9   :  { %219 = vsyncadd [#allocation3], 4294967264 }
   0xa   :  { %220 = dma.done.wait [#allocation6], 32  }
   0xb   :  { %221 = vsyncadd [#allocation6], 4294967264  ;;  %v54_v0 = vld [vmem:[#allocation2] sm:$0x3]  ;;  %vm58_vm0 = vcmask 123904   ;;  %vm104_vm5 = vcmask 1024  }
   0xc   :  { %v55_v1 = vmul.f32 0.25, %v54_v0  ;;  %v56_v2 = vld [vmem:[#allocation5] sm:$0x3]  ;;  %s130_s20 = sshll.u32 %s258_s2, 4  ;;  %s226_s22 = smov [#allocation7]   ;;  %s131_s20 = int_to_ptr.hbm [resolvable:$true] %s130_s20 }
   0xd   :  { %v57_v4 = vmul.f32 0.25, %v56_v2 }
   0xe   :  { %v59_v3 = vsel %vm58_vm0, %v55_v1, -inf }
   0xf   :  { %60 = vmax.xlane.f32.xlu0 %v59_v3  ;;  %v71_v5 = vsel %vm58_vm0, %v57_v4, -inf }
  0x17   :  { %72 = vmax.xlane.f32.xlu0 %v71_v5 }
  0x82   :  { %v61_v6 = vpop.xlane.xlu0 %60 }
  0x83   :  { %v62_v7 = vsub.f32 %v55_v1, %v61_v6 }
  0x85   :  { %v63_v8 = vmul.f32 1.442695, %v62_v7 }
  0x87   :  { %148 = vpow2.f32 %v63_v8 }
  0x8a   :  { %v73_v9 = vpop.xlane.xlu0 %72 }
  0x8b   :  { %v74_v10 = vsub.f32 %v57_v4, %v73_v9 }
  0x8d   :  { %v149_v11 = vpop.eup %148  ;;  %v75_v12 = vmul.f32 1.442695, %v74_v10 }
  0x8e   :  { %v65_v13 = vsel %vm58_vm0, %v149_v11, 0.0 }
  0x8f   :  { %150 = vpow2.f32 %v75_v12  ;;  %66 = vadd.xlane.f32.xlu1 %v65_v13 }
  0x95   :  { %v151_v14 = vpop.eup %150 }
  0x96   :  { %v77_v15 = vsel %vm58_vm0, %v151_v14, 0.0 }
  0x97   :  { %78 = vadd.xlane.f32.xlu1 %v77_v15 }
 0x102   :  { %v67_v16 = vpop.xlane.xlu1 %66 }
 0x103   :  { %152 = vlog2.f32 %v67_v16 }
 0x109   :  { %v153_v18 = vpop.eup %152 }
 0x10a   :  { %v79_v17 = vpop.xlane.xlu1 %78  ;;  %v69_v19 = vmul.f32 0.6931472, %v153_v18 }
 0x10b   :  { %154 = vlog2.f32 %v79_v17  ;;  %v99_v32 = vand.u32 2147483648, %v79_v17  ;;  %vm93_vm2 = vweird.f32 %v79_v17  ;;  %v97_v33 = vand.u32 2147483647, %v79_v17 }
 0x10c   :  { %v70_v22 = vsub.f32 %v62_v7, %v69_v19  ;;  %156 = vrcp.f32 %v79_v17 }
 0x10d   :  { %v100_v35 = vor.u32 1.1754944e-38, %v99_v32  ;;  %vm98_vm4 = vcmp.eq.f32.partialorder %v97_v33, 8.507059e+37 }
 0x111   :  { %v155_v20 = vpop.eup %154 }
 0x112   :  { %v81_v21 = vmul.f32 0.6931472, %v155_v20  ;;  %v157_v27 = vpop.eup %156 }
 0x113   :  { %v89_v28 = vmul.f32 %v157_v27, %v79_v17  ;;  %vm94_vm1 = vweird.f32 %v157_v27 }
 0x114   :  { %v82_v23 = vsub.f32 %v74_v10, %v81_v21  ;;  %vm95_vm3 = vmor %vm93_vm2, %vm94_vm1 }
 0x115   :  { %v90_v29 = vsub.f32 1.0, %v89_v28 }
 0x116   :  { %v83_v24 = vsub.f32 %v82_v23, %v70_v22 }
 0x117   :  { %v91_v30 = vmul.f32 %v157_v27, %v90_v29 }
 0x118   :  { %v84_v25 = vmul.f32 %v151_v14, %v83_v24 }
 0x119   :  { %v92_v31 = vadd.f32 %v157_v27, %v91_v30 }
 0x11a   :  { %v85_v26 = vsel %vm58_vm0, %v84_v25, 0.0 }
 0x11b   :  { %86 = vadd.xlane.f32.xlu2 %v85_v26  ;;  %v96_v34 = vsel %vm95_vm3, %v157_v27, %v92_v31 }
 0x11c   :  { %v101_v36 = vsel %vm98_vm4, %v100_v35, %v96_v34 }
 0x18e   :  { %v87_v37 = vpop.xlane.xlu2 %86 }
 0x18f   :  { %v103_v38 = vmul.f32 %v101_v36, %v87_v37 }
 0x191   :  { %v105_v39 = vsel %vm104_vm5, %v103_v38, 0.0 }
 0x192   :  { %106 = vadd.xlane.f32.xlu2 %v105_v39 }
 0x205   :  { %v107_v40 = vpop.xlane.xlu2 %106 }
 0x206   :  { %v108_v41 = vrot.slane %v107_v40, 4 }
 0x208   :  { %v109_v42 = vadd.f32 %v108_v41, %v107_v40 }
 0x20a   :  { %v110_v43 = vrot.slane %v109_v42, 2 }
 0x20c   :  { %v111_v44 = vadd.f32 %v110_v43, %v109_v42 }
 0x20e   :  { %v112_v45 = vrot.slane %v111_v44, 1 }
 0x210   :  { %v113_v46 = vadd.f32 %v112_v45, %v111_v44 }
 0x212   :  { %142 = vpush %v113_v46 }
 0x243   :  { %s143_s0 = spop %142 }
 0x244   :  { %s123_s21 = smul.f32 8.0, %s143_s0 }
 0x246   :  { %124 = sst [smem:[#allocation7]] %s123_s21 }
 0x247   :  { %133 = dma.smem_to_hbm %s226_s22, 16, %s131_s20, [#allocation4]  }
 0x248   :  { %222 = dma.done.wait [#allocation4], 16  }
 0x249   :  { %223 = vsyncadd [#allocation4], 4294967280 }
 0x24a   :  { %138 = sfence }
 0x24b   :  { %139 = vsyncpa [#allocation3], 1 }
 0x24c   :  { %140 = vsyncpa [#allocation6], 1 }
 0x24d   :  { %141 = vsyncpa [#allocation4], 1 }

</bundles_post_ra>
